<compile_context>
chip_gen: v6e
topology: v6e:2x2x1
jax: 0.10.0
libtpu: 0.0.40
codegen_flags: <defaults>
</compile_context>

<pallas_src>
import functools

import jax
import jax.numpy as jnp
import numpy as np
from jax.experimental import pallas as pl
from jax.experimental.pallas import tpu as pltpu


def _ffn_kernel(*refs, apply_attr):
    if apply_attr:
        x_ref, attr_ref, w1_ref, b1_ref, w2_ref, b2_ref, o_ref = refs
    else:
        x_ref, w1_ref, b1_ref, w2_ref, b2_ref, o_ref = refs
        attr_ref = None

    x = x_ref[...]                                     # (tile_n, C_in_p), compute dtype
    if apply_attr:
        attr_f32 = attr_ref[...]                       # (tile_n, 1) f32
        # Cast attr to the compute dtype first: avoids promoting the whole x
        # tile to f32 and back in the bf16 path.
        x = x * attr_f32.astype(x.dtype)               # TP with scalar '1x0e' attr

    # fctp_1 (rescale folded into W1) + bias, then SwishGate -> SiLU on 0e.
    h = jnp.dot(x, w1_ref[...], preferred_element_type=jnp.float32)
    h = h + b1_ref[...]
    h = h * jax.nn.sigmoid(h)                          # SiLU, f32 on VPU/EUP

    # fctp_2 (rescale folded into W2) + bias.  The per-row scalar attr multiply
    # is applied AFTER the matmul (over C_out lanes, not C_mid lanes); exact
    # because (h*attr) @ W2 == attr * (h @ W2) and the bias is added last.
    y = jnp.dot(h.astype(w2_ref.dtype), w2_ref[...],
                preferred_element_type=jnp.float32)
    if apply_attr:
        y = y * attr_f32
    o_ref[...] = (y + b2_ref[...]).astype(o_ref.dtype)


def _round_up(x, m):
    return ((x + m - 1) // m) * m


def _tpu_hw():
    """(vmem_capacity_bytes, tensorcores_per_chip) with conservative fallbacks."""
    vmem_cap = 64 * 1024 * 1024   # conservative default (v7x-sized)
    num_cores = 1
    try:
        info = pltpu.get_tpu_info()
        vmem_cap = int(getattr(info, "vmem_capacity_bytes", vmem_cap))
        for name in ("num_cores", "tensorcores_per_chip", "num_tensorcores",
                     "cores_per_chip"):
            v = getattr(info, name, None)
            if v:
                num_cores = int(v)
                break
        else:
            # Heuristic: 64 MiB VMEM per core implies a v7x-style 2-TC chip.
            if vmem_cap <= 64 * 1024 * 1024:
                num_cores = 2
    except Exception:
        pass
    return vmem_cap, num_cores


def _fit_tile_to_n(n, tile):
    """Prefer a tile that makes N_pad == N (removes the wrapper slice copy)."""
    n8 = _round_up(n, 8)
    if tile >= n8:
        return n8                                      # single step, minimal pad
    if n % 8 == 0:
        lo = max(8, ((tile * 3) // 4 // 8) * 8)        # within ~25% of budget tile
        t = (tile // 8) * 8
        while t >= lo:
            if n % t == 0:
                return t
            t -= 8
    return tile


def _choose_tile_n(n, c_in_p, c_mid_p, c_out_p, act_itemsize, out_itemsize,
                   apply_attr, vmem_budget_bytes, num_cores):
    """Largest row tile (multiple of 8) fitting the per-chip VMEM budget."""
    # Resident, single-buffered weights/biases (memory_space=VMEM, not pipelined).
    weight_bytes = (c_in_p * c_mid_p + c_mid_p * c_out_p) * act_itemsize \
                   + (c_mid_p + c_out_p) * 4
    # Streaming blocks are double-buffered.
    per_row = 2 * (c_in_p * act_itemsize + c_out_p * out_itemsize)
    if apply_attr:
        per_row += 2 * 128 * 4                         # (tile_n, 1) f32 occupies 128 lanes
    # f32 intermediates (h, SiLU temp, y, bias-add) + compute-dtype cast of h.
    per_row += (2 * c_mid_p + 2 * c_out_p) * 4 + c_mid_p * act_itemsize
    avail = max(vmem_budget_bytes - weight_bytes, per_row * 8)
    tile = max(8, min(2048, (int(avail // per_row) // 8) * 8))
    if num_cores > 1:
        # >= 4 grid steps so each TensorCore still pipelines >= 2 steps.
        tile = min(tile, max(8, _round_up(-(-n // 4), 8)))
    return _fit_tile_to_n(n, tile)


def ff_projection(node_input, node_attr, w1, b1, w2, b2, *,
                  attr_is_ones=False, compute_dtype=jnp.bfloat16,
                  out_dtype=None, tile_n=None):
    """Pallas TPU forward for FFProjection on scalar (0e) irreps.

    node_input: (N, C_in), node_attr: (N, 1) ('1x0e' attr),
    w1: (C_in, C_mid), b1: (C_mid,) or (1, C_mid), w2: (C_mid, C_out), b2 alike.
    """
    node_input = jnp.asarray(node_input)
    node_attr = jnp.asarray(node_attr).reshape(node_input.shape[0], 1)
    w1 = jnp.asarray(w1)
    w2 = jnp.asarray(w2)
    b1 = jnp.asarray(b1).reshape(1, -1)
    b2 = jnp.asarray(b2).reshape(1, -1)

    N, C_in = node_input.shape
    C_mid = w1.shape[1]
    C_out = w2.shape[1]
    out_dtype = compute_dtype if out_dtype is None else out_dtype

    # Fold the FullyConnectedTensorProductRescale 1/sqrt(fan_in) factors into
    # the weights once (in f32, using the original unpadded fan-in), THEN cast.
    w1s = (w1.astype(jnp.float32) * (1.0 / np.sqrt(C_in))).astype(compute_dtype)
    w2s = (w2.astype(jnp.float32) * (1.0 / np.sqrt(C_mid))).astype(compute_dtype)

    # Lane-dense padding of every channel dim (exact: zero weights/bias cols).
    C_in_p = max(128, _round_up(C_in, 128))
    C_mid_p = max(128, _round_up(C_mid, 128))
    C_out_p = max(128, _round_up(C_out, 128))

    act_itemsize = jnp.dtype(compute_dtype).itemsize
    out_itemsize = jnp.dtype(out_dtype).itemsize

    # Generation-aware VMEM budget/limit (128 MiB v5e/v6e, 64 MiB v7x, ...).
    vmem_cap, num_cores = _tpu_hw()
    vmem_limit = int(min(vmem_cap - 8 * 1024 * 1024, vmem_cap * 0.9))
    vmem_budget = int(vmem_limit * 0.85)

    if tile_n is None:
        tile_n = _choose_tile_n(N, C_in_p, C_mid_p, C_out_p, act_itemsize,
                                out_itemsize, not attr_is_ones, vmem_budget,
                                num_cores)
    else:
        tile_n = max(8, (int(tile_n) // 8) * 8)
    N_pad = _round_up(max(N, tile_n), tile_n)

    def pad2(a, rows, cols, dtype):
        a = a.astype(dtype)
        r, c = a.shape
        if r == rows and c == cols:
            return a
        return jnp.pad(a, ((0, rows - r), (0, cols - c)))

    x_p = pad2(node_input, N_pad, C_in_p, compute_dtype)
    attr_p = pad2(node_attr, N_pad, 1, jnp.float32)        # attr stays f32
    w1_p = pad2(w1s, C_in_p, C_mid_p, compute_dtype)
    w2_p = pad2(w2s, C_mid_p, C_out_p, compute_dtype)
    b1_p = pad2(b1, 1, C_mid_p, jnp.float32)
    b2_p = pad2(b2, 1, C_out_p, jnp.float32)

    grid = (N_pad // tile_n,)
    # Whole-array, single-buffered, loaded once (not pipelined per grid step).
    resident = pl.BlockSpec(memory_space=pltpu.MemorySpace.VMEM)

    in_specs = [pl.BlockSpec((tile_n, C_in_p), lambda i: (i, 0))]
    args = [x_p]
    if not attr_is_ones:
        in_specs.append(pl.BlockSpec((tile_n, 1), lambda i: (i, 0)))
        args.append(attr_p)
    in_specs += [resident, resident, resident, resident]
    args += [w1_p, b1_p, w2_p, b2_p]

    kernel = functools.partial(_ffn_kernel, apply_attr=not attr_is_ones)

    out = pl.pallas_call(
        kernel,
        out_shape=jax.ShapeDtypeStruct((N_pad, C_out_p), out_dtype),
        grid_spec=pltpu.PrefetchScalarGridSpec(
            num_scalar_prefetch=0,
            grid=grid,
            in_specs=in_specs,
            out_specs=pl.BlockSpec((tile_n, C_out_p), lambda i: (i, 0)),
        ),
        compiler_params=pltpu.CompilerParams(
            dimension_semantics=("parallel",),
            vmem_limit_bytes=vmem_limit,
        ),
    )(*args)

    if N_pad == N and C_out_p == C_out:
        return out
    return out[:N, :C_out]


def _reference(node_input, node_attr, w1, b1, w2, b2,
               compute_dtype=jnp.bfloat16, out_dtype=None):
    """Pure-JAX reference, op-for-op consistent with the kernel's compute path."""
    out_dtype = compute_dtype if out_dtype is None else out_dtype
    c_in, c_mid = w1.shape[0], w1.shape[1]
    b1 = jnp.asarray(b1).reshape(1, -1).astype(jnp.float32)
    b2 = jnp.asarray(b2).reshape(1, -1).astype(jnp.float32)
    attr = jnp.asarray(node_attr).reshape(-1, 1).astype(jnp.float32)
    w1c = (w1.astype(jnp.float32) * (1.0 / np.sqrt(c_in))).astype(compute_dtype)
    w2c = (w2.astype(jnp.float32) * (1.0 / np.sqrt(c_mid))).astype(compute_dtype)
    xc = node_input.astype(compute_dtype)
    xa = xc * attr.astype(compute_dtype)
    h = jnp.dot(xa, w1c, preferred_element_type=jnp.float32) + b1
    h = h * jax.nn.sigmoid(h)
    y = jnp.dot(h.astype(compute_dtype), w2c, preferred_element_type=jnp.float32)
    y = y * attr
    return (y + b2).astype(out_dtype)


if __name__ == "__main__":
    # Small shapes implied by the module: N nodes, scalar-irreps channels.
    N, C_in, C_mid, C_out = 16, 32, 64, 32

    key = jax.random.PRNGKey(0)
    k_x, k_a, k_w1, k_b1, k_w2, k_b2 = jax.random.split(key, 6)

    node_input = jax.random.normal(k_x, (N, C_in), dtype=jnp.float32)
    node_attr = jax.random.normal(k_a, (N, 1), dtype=jnp.float32)   # general 0e attr
    ones_attr = jnp.ones((N, 1), dtype=jnp.float32)                 # what Equiformer passes

    w1 = jax.random.normal(k_w1, (C_in, C_mid), dtype=jnp.float32)
    b1 = jax.random.normal(k_b1, (1, C_mid), dtype=jnp.float32) * 0.1
    w2 = jax.random.normal(k_w2, (C_mid, C_out), dtype=jnp.float32)
    b2 = jax.random.normal(k_b2, (1, C_out), dtype=jnp.float32) * 0.1

    # 1) Default bf16 path (bf16 activations/weights/output, f32 accumulation),
    #    general scalar node_attr; checked against a dtype-consistent reference.
    out_bf = jax.block_until_ready(
        ff_projection(node_input, node_attr, w1, b1, w2, b2))
    ref_bf = _reference(node_input, node_attr, w1, b1, w2, b2)
    np.testing.assert_allclose(np.asarray(out_bf, dtype=np.float32),
                               np.asarray(ref_bf, dtype=np.float32),
                               rtol=2e-2, atol=2e-2)

    # 2) f32 path, general scalar node_attr (exact check).
    out_f32 = jax.block_until_ready(
        ff_projection(node_input, node_attr, w1, b1, w2, b2,
                      compute_dtype=jnp.float32))
    ref_f32 = _reference(node_input, node_attr, w1, b1, w2, b2,
                         compute_dtype=jnp.float32)
    np.testing.assert_allclose(np.asarray(out_f32), np.asarray(ref_f32),
                               rtol=1e-5, atol=1e-5)

    # 3) f32 path, attr == ones with the attr-skipping fast path and f32 output.
    out_ones = jax.block_until_ready(
        ff_projection(node_input, ones_attr, w1, b1, w2, b2,
                      attr_is_ones=True, compute_dtype=jnp.float32,
                      out_dtype=jnp.float32))
    ref_ones = _reference(node_input, ones_attr, w1, b1, w2, b2,
                          compute_dtype=jnp.float32, out_dtype=jnp.float32)
    np.testing.assert_allclose(np.asarray(out_ones), np.asarray(ref_ones),
                               rtol=1e-5, atol=1e-5)

    # 4) Explicit tile override still works (forces >1 grid step at small N).
    out_tiled = jax.block_until_ready(
        ff_projection(node_input, node_attr, w1, b1, w2, b2,
                      compute_dtype=jnp.float32, tile_n=8))
    np.testing.assert_allclose(np.asarray(out_tiled), np.asarray(ref_f32),
                               rtol=1e-5, atol=1e-5)

    print("KERNEL_OK")
</pallas_src>

<mosaic_0001>
module attributes {stable_mosaic.version = 11 : i64} {
  func.func @_ffn_kernel(%arg0: i32, %arg1: memref<16x128xbf16, #tpu.memory_space<vmem>>, %arg2: memref<16x1xf32, #tpu.memory_space<vmem>>, %arg3: memref<128x128xbf16, #tpu.memory_space<vmem>>, %arg4: memref<1x128xf32, #tpu.memory_space<vmem>>, %arg5: memref<128x128xbf16, #tpu.memory_space<vmem>>, %arg6: memref<1x128xf32, #tpu.memory_space<vmem>>, %arg7: memref<16x128xbf16, #tpu.memory_space<vmem>>) attributes {dimension_semantics = [#tpu.dimension_semantics<parallel>], iteration_bounds = array<i64: 1>, scalar_prefetch = 0 : i64, scratch_operands = 0 : i64, tpu.core_type = #tpu.core_type<tc>, window_params = [{transform_indices = @transform_0, window_bounds = array<i64: 16, 128>}, {transform_indices = @transform_1, window_bounds = array<i64: 16, 1>}, {pipeline_mode = #tpu.pipeline_mode<synchronous>, transform_indices = @transform_2, window_bounds = array<i64: 128, 128>}, {pipeline_mode = #tpu.pipeline_mode<synchronous>, transform_indices = @transform_3, window_bounds = array<i64: 1, 128>}, {pipeline_mode = #tpu.pipeline_mode<synchronous>, transform_indices = @transform_4, window_bounds = array<i64: 128, 128>}, {pipeline_mode = #tpu.pipeline_mode<synchronous>, transform_indices = @transform_5, window_bounds = array<i64: 1, 128>}, {transform_indices = @transform_6, window_bounds = array<i64: 16, 128>}]} {
    %c0 = arith.constant 0 : index
    %c0_0 = arith.constant 0 : index
    %0 = vector.load %arg1[%c0, %c0_0] : memref<16x128xbf16, #tpu.memory_space<vmem>>, vector<16x128xbf16>
    %c0_1 = arith.constant 0 : index
    %c0_2 = arith.constant 0 : index
    %1 = vector.load %arg2[%c0_1, %c0_2] : memref<16x1xf32, #tpu.memory_space<vmem>>, vector<16x1xf32>
    %2 = arith.truncf %1 : vector<16x1xf32> to vector<16x1xbf16>
    %3 = vector.broadcast %2 : vector<16x1xbf16> to vector<16x128xbf16>
    %4 = arith.mulf %0, %3 : vector<16x128xbf16>
    %c0_3 = arith.constant 0 : index
    %c0_4 = arith.constant 0 : index
    %5 = vector.load %arg3[%c0_3, %c0_4] : memref<128x128xbf16, #tpu.memory_space<vmem>>, vector<128x128xbf16>
    %cst = arith.constant dense<0.000000e+00> : vector<16x128xf32>
    %6 = tpu.matmul %4, %5, %cst {dimension_numbers = #tpu.dot_dimension_numbers<[1], [0], [0], [1], [0, 0, 1, 1], [], []>} : vector<16x128xbf16>, vector<128x128xbf16>, vector<16x128xf32> -> vector<16x128xf32>
    %c0_5 = arith.constant 0 : index
    %c0_6 = arith.constant 0 : index
    %7 = vector.load %arg4[%c0_5, %c0_6] : memref<1x128xf32, #tpu.memory_space<vmem>>, vector<1x128xf32>
    %8 = vector.broadcast %7 : vector<1x128xf32> to vector<16x128xf32>
    %9 = arith.addf %6, %8 : vector<16x128xf32>
    %10 = arith.negf %9 : vector<16x128xf32>
    %11 = math.exp %10 : vector<16x128xf32>
    %cst_7 = arith.constant 1.000000e+00 : f32
    %12 = vector.broadcast %cst_7 : f32 to vector<16x128xf32>
    %13 = arith.addf %12, %11 : vector<16x128xf32>
    %14 = arith.divf %12, %13 : vector<16x128xf32>
    %15 = arith.mulf %9, %14 : vector<16x128xf32>
    %16 = arith.truncf %15 : vector<16x128xf32> to vector<16x128xbf16>
    %c0_8 = arith.constant 0 : index
    %c0_9 = arith.constant 0 : index
    %17 = vector.load %arg5[%c0_8, %c0_9] : memref<128x128xbf16, #tpu.memory_space<vmem>>, vector<128x128xbf16>
    %cst_10 = arith.constant dense<0.000000e+00> : vector<16x128xf32>
    %18 = tpu.matmul %16, %17, %cst_10 {dimension_numbers = #tpu.dot_dimension_numbers<[1], [0], [0], [1], [0, 0, 1, 1], [], []>} : vector<16x128xbf16>, vector<128x128xbf16>, vector<16x128xf32> -> vector<16x128xf32>
    %19 = vector.broadcast %1 : vector<16x1xf32> to vector<16x128xf32>
    %20 = arith.mulf %18, %19 : vector<16x128xf32>
    %c0_11 = arith.constant 0 : index
    %c0_12 = arith.constant 0 : index
    %21 = vector.load %arg6[%c0_11, %c0_12] : memref<1x128xf32, #tpu.memory_space<vmem>>, vector<1x128xf32>
    %22 = vector.broadcast %21 : vector<1x128xf32> to vector<16x128xf32>
    %23 = arith.addf %20, %22 : vector<16x128xf32>
    %24 = arith.truncf %23 : vector<16x128xf32> to vector<16x128xbf16>
    %c0_13 = arith.constant 0 : index
    %c0_14 = arith.constant 0 : index
    %25 = vector.load %arg7[%c0_13, %c0_14] : memref<16x128xbf16, #tpu.memory_space<vmem>>, vector<16x128xbf16>
    tpu.vector_store %arg7[%c0_13, %c0_14], %24 {strides = array<i32>} : memref<16x128xbf16, #tpu.memory_space<vmem>>, vector<16x128xbf16>,
    return
  }
  func.func @transform_0(%arg0: i32) -> (i32, i32) {
    %c0_i32 = arith.constant 0 : i32
    %c0_i32_0 = arith.constant 0 : i32
    return %arg0, %c0_i32 : i32, i32
  }
  func.func @transform_1(%arg0: i32) -> (i32, i32) {
    %c0_i32 = arith.constant 0 : i32
    %c0_i32_0 = arith.constant 0 : i32
    return %arg0, %c0_i32 : i32, i32
  }
  func.func @transform_2(%arg0: i32) -> (i32, i32) {
    %c0_i32 = arith.constant 0 : i32
    %c0_i32_0 = arith.constant 0 : i32
    %c0_i32_1 = arith.constant 0 : i32
    return %c0_i32, %c0_i32_0 : i32, i32
  }
  func.func @transform_3(%arg0: i32) -> (i32, i32) {
    %c0_i32 = arith.constant 0 : i32
    %c0_i32_0 = arith.constant 0 : i32
    %c0_i32_1 = arith.constant 0 : i32
    return %c0_i32, %c0_i32_0 : i32, i32
  }
  func.func @transform_4(%arg0: i32) -> (i32, i32) {
    %c0_i32 = arith.constant 0 : i32
    %c0_i32_0 = arith.constant 0 : i32
    %c0_i32_1 = arith.constant 0 : i32
    return %c0_i32, %c0_i32_0 : i32, i32
  }
  func.func @transform_5(%arg0: i32) -> (i32, i32) {
    %c0_i32 = arith.constant 0 : i32
    %c0_i32_0 = arith.constant 0 : i32
    %c0_i32_1 = arith.constant 0 : i32
    return %c0_i32, %c0_i32_0 : i32, i32
  }
  func.func @transform_6(%arg0: i32) -> (i32, i32) {
    %c0_i32 = arith.constant 0 : i32
    %c0_i32_0 = arith.constant 0 : i32
    return %arg0, %c0_i32 : i32, i32
  }
}

</mosaic_0001>

<bundles_post_ra>
// kernel: tpu_custom_call.1
= control target key start
LH: loop header
LB: loop body
LE: loop exit
PB: predicated region body
PF: predicated region fallthrough
CT: control target
= control target key end

     0   :  { %11 = vsyncpa [#allocation3], 0  ;;  %s657_s0 = inlined_call_operand.vmem [shape: bf16[16,128], index: 0, kind: input, shape index: {}]   ;;  %s658_s1 = inlined_call_operand.vmem [shape: f32[16,1], index: 1, kind: input, shape index: {}]   ;;  %s659_s2 = inlined_call_operand.hbm [shape: bf16[128,128], index: 2, kind: input, shape index: {}]   ;;  %s660_s3 = inlined_call_operand.vmem [shape: f32[1,128], index: 3, kind: input, shape index: {}]   ;;  %s661_s4 = inlined_call_operand.hbm [shape: bf16[128,128], index: 4, kind: input, shape index: {}]   ;;  %s662_s5 = inlined_call_operand.vmem [shape: f32[1,128], index: 5, kind: input, shape index: {}]   ;;  %s663_s6 = inlined_call_operand.hbm [shape: bf16[16,128], index: 6, kind: output, shape index: {}]  }
   0x1   :  { %12 = vsyncpa [#allocation6], 0 }
   0x2   :  { %13 = vsyncpa [#allocation4], 0  ;;  %s558_s21 = smov [#allocation2]  }
   0x3   :  { %s23_s22 = sshll.u32 %s558_s21, 4  ;;  %s24_s22 = int_to_ptr.vmem [resolvable:$true] %s23_s22 }
   0x4   :  { %s500_s23 = scalar_lea.vmem %s24_s22, 1024  ;;  %p505_p1 = scmp.lt.s32.totalorder %s24_s22, %s24_s22 }
   0x5   :  { %p501_p0 = scmp.ne.s32.totalorder %s24_s22, %s500_s23  ;;  %p506_p2 = scmp.lt.s32.totalorder %s500_s23, %s500_s23 }
   0x7   :  { %p507_p3 = por %p506_p2, %p505_p1 }
   0x9   :  { %p508_p4 = pnand %p507_p3, %p501_p0 }
   0xb   :  { %511 = shalt.err (!%p508_p4)
}
   0xc   :  { %s559_s24 = smov 64   ;;  %s560_s25 = smov 4  }
   0xd   :  { %29 = dma.hbm_to_vmem [thread:$0]  %s659_s2, 1024, %s24_s22, [#allocation3], %s559_s24, %s559_s24, %s560_s25  }
   0xe   :  { %s561_s28 = smov [#allocation5]  }
   0xf   :  { %s37_s29 = sshll.u32 %s561_s28, 4  ;;  %s38_s29 = int_to_ptr.vmem [resolvable:$true] %s37_s29 }
  0x10   :  { %s520_s30 = scalar_lea.vmem %s38_s29, 1024  ;;  %p525_p6 = scmp.lt.s32.totalorder %s38_s29, %s38_s29 }
  0x11   :  { %p521_p5 = scmp.ne.s32.totalorder %s38_s29, %s520_s30  ;;  %p526_p7 = scmp.lt.s32.totalorder %s520_s30, %s520_s30 }
  0x13   :  { %p527_p8 = por %p526_p7, %p525_p6 }
  0x15   :  { %p528_p9 = pnand %p527_p8, %p521_p5 }
  0x17   :  { %531 = shalt.err (!%p528_p9)
}
  0x18   :  { %43 = dma.hbm_to_vmem [thread:$0]  %s661_s4, 1024, %s38_s29, [#allocation6], %s559_s24, %s559_s24, %s560_s25  }
  0x19   :  { %552 = dma.done.wait [#allocation3], 1024  }
  0x1a   :  { %553 = vsyncadd [#allocation3], 4294966272 }
  0x1b   :  { %554 = dma.done.wait [#allocation6], 1024  }
  0x1c   :  { %555 = vsyncadd [#allocation6], 4294966272  ;;  %v562_v0 = vmov 0   ;;  %v563_v1 = vmov 0.0   ;;  %v55_v2 = vld [vmem:[%s658_s1] sm:$0xff]  ;;  %v56_v3 = vld [vmem:[%s658_s1 + $0x8] sm:$0xff]  ;;  %v66_v15 = vlaneseq }
  0x1d   :  { %466 = vset.pattern.permute.xlu0 %v562_v0  ;;  %416 = vmatprep.subr.bf16.mxu0 %v563_v1  ;;  %v57_v4 = vpack.c.bf16 %v56_v3, %v55_v2  ;;  %v468_v5 = vld [vmem:[#allocation2 + $0x38] sm:$0xff]   ;;  %v469_v6 = vld [vmem:[#allocation2 + $0x30] sm:$0xff]   ;;  %vm564_vm0 = vmmov 0   ;;  %v470_v7 = vld [vmem:[#allocation2 + $0x28] sm:$0xff]   ;;  %v565_v13 = vmov 839922192  }
  0x1e   :  { %436 = vmatprep.subr.bf16.mxu1 %v563_v1  ;;  %467 = vset.pattern.permute.xlu1 %v562_v0  ;;  %v471_v8 = vld [vmem:[#allocation2 + $0x20] sm:$0xff]   ;;  %v472_v9 = vld [vmem:[#allocation2 + $0x18] sm:$0xff]   ;;  %v473_v10 = vld [vmem:[#allocation2 + $0x10] sm:$0xff]   ;;  %v64_v14 = vunpack.c.l.s4 %v565_v13  ;;  %v566_v16 = vmov 1985246804   ;;  %v67_v19 = vshrl.u32 %v66_v15, 7 }
  0x1f   :  { %326 = vperm.xlu1 %467, %v56_v3   ;;  %60 = vperm.xlu0 %466, %v57_v4   ;;  %v474_v11 = vld [vmem:[#allocation2 + $0x8] sm:$0xff]   ;;  %v475_v12 = vld [vmem:[#allocation2] sm:$0xff]   ;;  %v71_v17 = vunpack.c.l.s4 %v566_v16  ;;  %v476_v31 = vld [vmem:[#allocation5 + $0x38] sm:$0xff]   ;;  %s567_s16 = smov [#allocation7]  }
  0x20   :  { %417 = vmatpush3.bf16.msra.mxu0 %v468_v5  ;;  %432 = vmatprep.mubr.msk.bf16.mxu0 %vm564_vm0, %v563_v1  ;;  %v65_v18 = vunpack.c.0.s8 %v64_v14  ;;  %v53_v24 = vld [vmem:[%s657_s0] sm:$0xf]  ;;  %v54_v25 = vld [vmem:[%s657_s0 + $0x4] sm:$0xf]  ;;  %v477_v32 = vld [vmem:[#allocation5 + $0x30] sm:$0xff]   ;;  %s355_s17 = sshll.u32 %s567_s16, 4  ;;  %s356_s17 = int_to_ptr.vmem [resolvable:$true] %s355_s17 }
  0x21   :  { %418 = vmatprep.subr.bf16.mxu0 %v563_v1  ;;  %452 = vmatprep.mubr.msk.bf16.mxu1 %vm564_vm0, %v563_v1  ;;  %v72_v20 = vunpack.c.0.s8 %v71_v17  ;;  %v478_v33 = vld [vmem:[#allocation5 + $0x28] sm:$0xff]   ;;  %v479_v34 = vld [vmem:[#allocation5 + $0x20] sm:$0xff]   ;;  %v480_v35 = vld [vmem:[#allocation5 + $0x18] sm:$0xff]   ;;  %s532_s18 = scalar_lea.vmem %s356_s17, 128  ;;  %p537_p11 = scmp.lt.s32.totalorder %s356_s17, %s356_s17 }
  0x22   :  { %v68_v21 = vsub.s32 %v65_v18, %v67_v19  ;;  %437 = vmatpush3.bf16.msra.mxu1 %v476_v31  ;;  %v481_v36 = vld [vmem:[#allocation5 + $0x10] sm:$0xff]   ;;  %v482_v37 = vld [vmem:[#allocation5 + $0x8] sm:$0xff]   ;;  %v483_v38 = vld [vmem:[#allocation5] sm:$0xff]   ;;  %p533_p10 = scmp.ne.s32.totalorder %s356_s17, %s532_s18  ;;  %p538_p12 = scmp.lt.s32.totalorder %s532_s18, %s532_s18 }
  0x23   :  { %321 = vperm.xlu0 %466, %v55_v2   ;;  %v75_v22 = vsub.s32 %v72_v20, %v67_v19  ;;  %438 = vmatprep.subr.bf16.mxu1 %v563_v1  ;;  %v368_v39 = vld [vmem:[%s660_s3] ss:$0 sm:$0xff] }
  0x24   :  { %419 = vmatpush3.bf16.msra.mxu0 %v469_v6  ;;  %v388_v62 = vld [vmem:[%s662_s5] ss:$0 sm:$0xff]  ;;  %p539_p13 = por %p538_p12, %p537_p11 }
  0x25   :  { %420 = vmatprep.subr.bf16.mxu0 %v563_v1 }
  0x26   :  { %439 = vmatpush3.bf16.msra.mxu1 %v477_v32  ;;  %p540_p0 = pnand %p539_p13, %p533_p10 }
  0x27   :  { %440 = vmatprep.subr.bf16.mxu1 %v563_v1 }
  0x28   :  { %421 = vmatpush3.bf16.msra.mxu0 %v470_v7 }
  0x29   :  { %422 = vmatprep.subr.bf16.mxu0 %v563_v1 }
  0x2a   :  { %441 = vmatpush3.bf16.msra.mxu1 %v478_v33 }
  0x2b   :  { %442 = vmatprep.subr.bf16.mxu1 %v563_v1 }
  0x2c   :  { %423 = vmatpush3.bf16.msra.mxu0 %v471_v8 }
  0x2d   :  { %424 = vmatprep.subr.bf16.mxu0 %v563_v1 }
  0x2e   :  { %443 = vmatpush3.bf16.msra.mxu1 %v479_v34 }
  0x2f   :  { %444 = vmatprep.subr.bf16.mxu1 %v563_v1 }
  0x30   :  { %425 = vmatpush3.bf16.msra.mxu0 %v472_v9 }
  0x31   :  { %426 = vmatprep.subr.bf16.mxu0 %v563_v1 }
  0x32   :  { %445 = vmatpush3.bf16.msra.mxu1 %v480_v35 }
  0x33   :  { %446 = vmatprep.subr.bf16.mxu1 %v563_v1 }
  0x34   :  { %427 = vmatpush3.bf16.msra.mxu0 %v473_v10 }
  0x35   :  { %428 = vmatprep.subr.bf16.mxu0 %v563_v1 }
  0x36   :  { %447 = vmatpush3.bf16.msra.mxu1 %v481_v36 }
  0x37   :  { %448 = vmatprep.subr.bf16.mxu1 %v563_v1 }
  0x38   :  { %429 = vmatpush3.bf16.msra.mxu0 %v474_v11 }
  0x39   :  { %430 = vmatprep.subr.bf16.mxu0 %v563_v1 }
  0x3a   :  { %449 = vmatpush3.bf16.msra.mxu1 %v482_v37 }
  0x3b   :  { %450 = vmatprep.subr.bf16.mxu1 %v563_v1 }
  0x3c   :  { %431 = vmatpush3.bf16.msra.mxu0 %v475_v12 }
  0x3e   :  { %451 = vmatpush3.bf16.msra.mxu1 %v483_v38 }
  0x9a   :  { %v61_v23 = vpop.permute.xlu0 %60  ;;  %v327_v60 = vpop.permute.xlu1 %326 }
  0x9b   :  { %v69_v26 = vrot.slane %v61_v23, %v68_v21  ;;  %v76_v27 = vrot.slane %v61_v23, %v75_v22 }
  0x9d   :  { %v79_v28 = vmul.bf16 %v69_v26, %v53_v24  ;;  %v80_v29 = vmul.bf16 %v76_v27, %v54_v25 }
  0x9e   :  { %v322_v58 = vpop.permute.xlu0 %321 }
  0x9f   :  { %v369_v30 = vcombine.low %v79_v28, %v80_v29 }
  0xa1   :  { %433 = vmatmul.mubr.bf16.vlgmr.msra.gmra.mxu0 %v369_v30 }
 0x161   :  { %v192_v40 = vpop.f32.mrf.mxu0 }
 0x162   :  { %v193_v41 = vadd.f32 %v368_v39, %v192_v40 }
 0x163   :  { %v434_v42 = vpop.f32.mrf.mxu0 }
 0x164   :  { %v378_v43 = vmul.f32 -1.442695, %v193_v41 }
 0x165   :  { %v195_v44 = vpop.f32.mrf.mxu0 }
 0x166   :  { %484 = vpow2.f32 %v378_v43  ;;  %v196_v45 = vadd.f32 %v368_v39, %v195_v44 }
 0x167   :  { %v435_v46 = vpop.f32.mrf.mxu0 }
 0x168   :  { %v379_v47 = vmul.f32 -1.442695, %v196_v45 }
 0x16a   :  { %486 = vpow2.f32 %v379_v47 }
 0x173   :  { %v485_v48 = vpop.eup %484 }
 0x174   :  { %v205_v49 = vadd.f32 1.0, %v485_v48 }
 0x176   :  { %488 = vrcp.f32 %v205_v49 }
 0x177   :  { %v487_v50 = vpop.eup %486 }
 0x178   :  { %v206_v51 = vadd.f32 1.0, %v487_v50 }
 0x17a   :  { %490 = vrcp.f32 %v206_v51 }
 0x183   :  { %v489_v52 = vpop.eup %488 }
 0x184   :  { %v211_v54 = vmul.f32 %v489_v52, %v193_v41 }
 0x187   :  { %v491_v53 = vpop.eup %490 }
 0x188   :  { %v212_v55 = vmul.f32 %v491_v53, %v196_v45 }
 0x18a   :  { %v213_v56 = vpack.c.bf16 %v212_v55, %v211_v54 }
 0x18c   :  { %453 = vmatmul.mubr.bf16.vlgmr.msra.gmra.mxu1 %v213_v56 }
 0x24c   :  { %v312_v57 = vpop.f32.mrf.mxu1 }
 0x24d   :  { %v329_v61 = vmul.f32 %v322_v58, %v312_v57 }
 0x24e   :  { %v454_v59 = vpop.f32.mrf.mxu1 }
 0x24f   :  { %v338_v2 = vadd.f32 %v388_v62, %v329_v61 }
 0x250   :  { %v315_v63 = vpop.f32.mrf.mxu1 }
 0x251   :  { %v330_v0 = vmul.f32 %v327_v60, %v315_v63 }
 0x252   :  { %v455_v1 = vpop.f32.mrf.mxu1 }
 0x253   :  { %v339_v3 = vadd.f32 %v388_v62, %v330_v0 }
 0x255   :  { %v396_v4 = vpack.c.bf16 %v339_v3, %v338_v2 }
 0x257   :  { %397 = vst [vmem:[#allocation7] sm:$0xff] %v396_v4  }
 0x258   :  { %543 = shalt.err (!%p540_p0)
}
 0x259   :  { %361 = dma.vmem_to_hbm [thread:$0]  %s356_s17, 128, %s663_s6, [#allocation4], %s559_s24, %s559_s24, %s560_s25  }
 0x25a   :  { %556 = dma.done.wait [#allocation4], 128  }
 0x25b   :  { %557 = vsyncadd [#allocation4], 4294967168 }
 0x25c   :  { %365 = vsyncpa [#allocation3], 1 }
 0x25d   :  { %366 = vsyncpa [#allocation6], 1 }
 0x25e   :  { %367 = vsyncpa [#allocation4], 1 }

</bundles_post_ra>
